<compile_context>
chip_gen: v7x
topology: tpu7x:2x2x1
jax: 0.10.0
libtpu: 0.0.40
codegen_flags: <defaults>
</compile_context>

<pallas_src>
import functools

import jax
import jax.numpy as jnp
from jax.experimental import pallas as pl
from jax.experimental.pallas import tpu as pltpu

LANES = 128          # vreg lane width; last dim of every block
ACC_ROWS = 32        # 4 independent (8,128) vreg accumulation chains
BLK_M_MAX = 2048     # 2048*128*4 B = 1 MiB per input block; x2 inputs x2 buffers = 4 MiB VMEM


def _num_tensorcores() -> int:
    """TensorCores per chip that share the grid's 'parallel' axis (megacore / dual-TC)."""
    try:
        kind = jax.devices()[0].device_kind.lower()
    except Exception:
        return 1
    if "v7" in kind or "v4" in kind or "v5p" in kind:
        return 2
    return 1  # v5e ("v5 lite"), v6e, anything unknown: single TensorCore


def _compound_loss_kernel(p_ref, t_ref, out_ref, acc_ref, *, blk_m, binary_targets):
    """Grid: (core, tile). acc_ref is a (ACC_ROWS, LANES) VMEM accumulator resident across tiles."""
    i = pl.program_id(1)

    @pl.when(i == 0)
    def _init():
        acc_ref[...] = jnp.zeros_like(acc_ref)

    p = p_ref[...]
    t = t_ref[...]

    if binary_targets:
        # Hard {0,1} targets: BCE = -clamp(log(pt), -100) with pt = t*p + (1-t)*(1-p).
        # One EUP log per element instead of two; the focal pt differs from exp(-clamped BCE)
        # only when pt < e^-100, far below f32 resolution.
        pt = t * p + (1.0 - t) * (1.0 - p)
        bce = jnp.minimum(-jnp.log(pt), 100.0)
        d = 1.0 - pt
    else:
        # Exact PyTorch BCE semantics for arbitrary soft targets in [0, 1].
        log_p = jnp.maximum(jnp.log(p), -100.0)
        log_1mp = jnp.maximum(jnp.log(1.0 - p), -100.0)
        bce = -(t * log_p + (1.0 - t) * log_1mp)
        d = 1.0 - jnp.exp(-bce)

    # focal + bce with alpha=1 / gamma=2 folded:  bce * (1 + (1 - pt)^2).
    x = bce * (1.0 + d * d)

    # Reduce the (blk_m, 128) block onto ACC_ROWS sublane rows: ACC_ROWS//8 independent vreg
    # accumulation chains (VPU adds only); cross-lane reduce happens once in the wrapper.
    acc_ref[...] += x.reshape(blk_m // ACC_ROWS, ACC_ROWS, LANES).sum(axis=0)

    @pl.when(i == pl.num_programs(1) - 1)
    def _finalize():
        out_ref[...] = acc_ref[...][None]   # (1, ACC_ROWS, LANES) per-core partial sums


def compound_loss(inputs, targets, *, assume_binary_targets=True):
    """CompoundLoss forward.  inputs: probabilities in (0,1); targets: labels; returns scalar.

    assume_binary_targets=True (default, matches the module's binary-classification use) takes
    the single-log BCE path; pass False for soft targets to get exact PyTorch BCE semantics.
    """
    inputs = inputs.reshape(-1).astype(jnp.float32)
    targets = targets.reshape(-1).astype(jnp.float32)
    n = inputs.shape[0]

    num_cores = _num_tensorcores()
    rows_total = pl.cdiv(n, LANES)
    rows_per_core = max(1, pl.cdiv(rows_total, num_cores))
    blk_m = min(BLK_M_MAX,
                max(ACC_ROWS, ((rows_per_core + ACC_ROWS - 1) // ACC_ROWS) * ACC_ROWS))
    tiles_per_core = max(1, pl.cdiv(rows_per_core, blk_m))
    total_rows = num_cores * tiles_per_core * blk_m
    padded = total_rows * LANES

    # Pad tail with p=1, t=1 -> pt=1, bce=0: padded elements contribute exactly nothing, so no
    # in-kernel mask is needed.  allow_input_fusion (below) lets XLA fuse this pad/reshape into
    # the pallas input DMA instead of writing full padded copies to HBM.
    pad = padded - n
    p2 = jnp.pad(inputs, (0, pad), constant_values=1.0).reshape(total_rows, LANES)
    t2 = jnp.pad(targets, (0, pad), constant_values=1.0).reshape(total_rows, LANES)

    kernel = functools.partial(_compound_loss_kernel, blk_m=blk_m,
                               binary_targets=assume_binary_targets)

    partials = pl.pallas_call(
        kernel,
        out_shape=jax.ShapeDtypeStruct((num_cores, ACC_ROWS, LANES), jnp.float32),
        grid_spec=pltpu.PrefetchScalarGridSpec(
            num_scalar_prefetch=0,
            grid=(num_cores, tiles_per_core),
            in_specs=[
                pl.BlockSpec((blk_m, LANES),
                             lambda c, i, T=tiles_per_core: (c * T + i, 0)),
                pl.BlockSpec((blk_m, LANES),
                             lambda c, i, T=tiles_per_core: (c * T + i, 0)),
            ],
            out_specs=pl.BlockSpec((1, ACC_ROWS, LANES), lambda c, i: (c, 0, 0)),
            scratch_shapes=[pltpu.VMEM((ACC_ROWS, LANES), jnp.float32)],
        ),
        compiler_params=pltpu.CompilerParams(
            dimension_semantics=("parallel", "arbitrary"),
            allow_input_fusion=[True, True],
        ),
    )(p2, t2)

    # Tiny final cross-lane reduction (num_cores * 32 * 128 f32) done by XLA in the wrapper.
    return jnp.sum(partials) / jnp.float32(n)


def _reference(p, t):
    """Pure-JAX mirror of CompoundLoss (FocalLoss + BCELoss), exact PyTorch semantics."""
    log_p = jnp.maximum(jnp.log(p), -100.0)
    log_1mp = jnp.maximum(jnp.log(1.0 - p), -100.0)
    bce = -(t * log_p + (1.0 - t) * log_1mp)
    pt = jnp.exp(-bce)
    focal = 1.0 * (1.0 - pt) ** 2 * bce
    return jnp.mean(focal) + jnp.mean(bce)


if __name__ == "__main__":
    key = jax.random.PRNGKey(0)

    # Binary-target path (the module's intended use in ATM-TCR).
    for n in (300, 4097, 65536):
        key, k1, k2 = jax.random.split(key, 3)
        inputs = jax.nn.sigmoid(jax.random.normal(k1, (n,), jnp.float32))
        targets = jax.random.bernoulli(k2, 0.5, (n,)).astype(jnp.float32)

        loss = jax.block_until_ready(compound_loss(inputs, targets))
        ref = jax.block_until_ready(_reference(inputs, targets))

        assert jnp.isfinite(loss), f"non-finite loss at n={n}: {loss}"
        assert jnp.allclose(loss, ref, rtol=1e-4, atol=1e-5), (
            f"mismatch at n={n}: {loss} vs {ref}"
        )

    # Soft-target path (exact two-log PyTorch BCE).
    key, k1, k2 = jax.random.split(key, 3)
    n = 4097
    inputs = jax.nn.sigmoid(jax.random.normal(k1, (n,), jnp.float32))
    targets = jax.random.uniform(k2, (n,), jnp.float32)
    loss = jax.block_until_ready(
        compound_loss(inputs, targets, assume_binary_targets=False))
    ref = jax.block_until_ready(_reference(inputs, targets))
    assert jnp.allclose(loss, ref, rtol=1e-4, atol=1e-5), (
        f"soft-target mismatch: {loss} vs {ref}"
    )

    print("KERNEL_OK")
</pallas_src>

<mosaic_0001>
module attributes {stable_mosaic.version = 11 : i64} {
  func.func @_compound_loss_kernel(%arg0: i32, %arg1: i32, %arg2: memref<32x128xf32, #tpu.memory_space<vmem>>, %arg3: memref<32x128xf32, #tpu.memory_space<vmem>>, %arg4: memref<1x32x128xf32, #tpu.memory_space<vmem>>, %arg5: memref<32x128xf32, #tpu.memory_space<vmem>>) attributes {dimension_semantics = [#tpu.dimension_semantics<parallel>, #tpu.dimension_semantics<arbitrary>], iteration_bounds = array<i64: 1, 1>, scalar_prefetch = 0 : i64, scratch_operands = 1 : i64, tpu.core_type = #tpu.core_type<tc>, window_params = [{transform_indices = @transform_0, window_bounds = array<i64: 32, 128>}, {transform_indices = @transform_1, window_bounds = array<i64: 32, 128>}, {transform_indices = @transform_2, window_bounds = array<i64: 1, 32, 128>}]} {
    %c0_i32 = arith.constant 0 : i32
    %0 = arith.cmpi eq, %arg1, %c0_i32 : i32
    %1 = arith.extui %0 : i1 to i32
    %c0_i32_0 = arith.constant 0 : i32
    %2 = arith.cmpi ne, %1, %c0_i32_0 : i32
    scf.if %2 {
      %cst_16 = arith.constant 0.000000e+00 : f32
      %31 = vector.broadcast %cst_16 : f32 to vector<32x128xf32>
      %c0_17 = arith.constant 0 : index
      %c0_18 = arith.constant 0 : index
      %32 = vector.load %arg5[%c0_17, %c0_18] : memref<32x128xf32, #tpu.memory_space<vmem>>, vector<32x128xf32>
      tpu.vector_store %arg5[%c0_17, %c0_18], %31 {strides = array<i32>} : memref<32x128xf32, #tpu.memory_space<vmem>>, vector<32x128xf32>,
    } else {
    }
    %c0 = arith.constant 0 : index
    %c0_1 = arith.constant 0 : index
    %3 = vector.load %arg2[%c0, %c0_1] : memref<32x128xf32, #tpu.memory_space<vmem>>, vector<32x128xf32>
    %c0_2 = arith.constant 0 : index
    %c0_3 = arith.constant 0 : index
    %4 = vector.load %arg3[%c0_2, %c0_3] : memref<32x128xf32, #tpu.memory_space<vmem>>, vector<32x128xf32>
    %5 = arith.mulf %4, %3 : vector<32x128xf32>
    %cst = arith.constant 1.000000e+00 : f32
    %6 = vector.broadcast %cst : f32 to vector<32x128xf32>
    %7 = arith.subf %6, %4 : vector<32x128xf32>
    %cst_4 = arith.constant 1.000000e+00 : f32
    %8 = vector.broadcast %cst_4 : f32 to vector<32x128xf32>
    %9 = arith.subf %8, %3 : vector<32x128xf32>
    %10 = arith.mulf %7, %9 : vector<32x128xf32>
    %11 = arith.addf %5, %10 : vector<32x128xf32>
    %12 = math.log %11 : vector<32x128xf32>
    %cst_5 = arith.constant 0.000000e+00 : f32
    %13 = vector.broadcast %cst_5 : f32 to vector<32x128xf32>
    %14 = arith.subf %13, %12 : vector<32x128xf32>
    %cst_6 = arith.constant 1.000000e+02 : f32
    %15 = vector.broadcast %cst_6 : f32 to vector<32x128xf32>
    %16 = arith.minimumf %14, %15 : vector<32x128xf32>
    %cst_7 = arith.constant 1.000000e+00 : f32
    %17 = vector.broadcast %cst_7 : f32 to vector<32x128xf32>
    %18 = arith.subf %17, %11 : vector<32x128xf32>
    %19 = arith.mulf %18, %18 : vector<32x128xf32>
    %cst_8 = arith.constant 1.000000e+00 : f32
    %20 = vector.broadcast %cst_8 : f32 to vector<32x128xf32>
    %21 = arith.addf %20, %19 : vector<32x128xf32>
    %22 = arith.mulf %16, %21 : vector<32x128xf32>
    %c0_9 = arith.constant 0 : index
    %c0_10 = arith.constant 0 : index
    %23 = vector.load %arg5[%c0_9, %c0_10] : memref<32x128xf32, #tpu.memory_space<vmem>>, vector<32x128xf32>
    %24 = vector.shape_cast %22 : vector<32x128xf32> to vector<1x32x128xf32>
    %cst_11 = arith.constant dense<0.000000e+00> : vector<32x128xf32>
    %25 = vector.multi_reduction <add>, %24, %cst_11 [0] : vector<1x32x128xf32> to vector<32x128xf32>
    %26 = arith.addf %23, %25 : vector<32x128xf32>
    %c0_12 = arith.constant 0 : index
    %c0_13 = arith.constant 0 : index
    %27 = vector.load %arg5[%c0_12, %c0_13] : memref<32x128xf32, #tpu.memory_space<vmem>>, vector<32x128xf32>
    tpu.vector_store %arg5[%c0_12, %c0_13], %26 {strides = array<i32>} : memref<32x128xf32, #tpu.memory_space<vmem>>, vector<32x128xf32>,
    %c0_i32_14 = arith.constant 0 : i32
    %28 = arith.cmpi eq, %arg1, %c0_i32_14 : i32
    %29 = arith.extui %28 : i1 to i32
    %c0_i32_15 = arith.constant 0 : i32
    %30 = arith.cmpi ne, %29, %c0_i32_15 : i32
    scf.if %30 {
      %c0_16 = arith.constant 0 : index
      %c0_17 = arith.constant 0 : index
      %31 = vector.load %arg5[%c0_16, %c0_17] : memref<32x128xf32, #tpu.memory_space<vmem>>, vector<32x128xf32>
      %32 = vector.shape_cast %31 : vector<32x128xf32> to vector<1x32x128xf32>
      %c0_18 = arith.constant 0 : index
      %c0_19 = arith.constant 0 : index
      %c0_20 = arith.constant 0 : index
      %33 = vector.load %arg4[%c0_18, %c0_19, %c0_20] : memref<1x32x128xf32, #tpu.memory_space<vmem>>, vector<1x32x128xf32>
      tpu.vector_store %arg4[%c0_18, %c0_19, %c0_20], %32 {strides = array<i32>} : memref<1x32x128xf32, #tpu.memory_space<vmem>>, vector<1x32x128xf32>,
    } else {
    }
    return
  }
  func.func @transform_0(%arg0: i32, %arg1: i32) -> (i32, i32) {
    %c1_i32 = arith.constant 1 : i32
    %0 = arith.muli %arg0, %c1_i32 : i32
    %1 = arith.addi %0, %arg1 : i32
    %c0_i32 = arith.constant 0 : i32
    %c0_i32_0 = arith.constant 0 : i32
    return %1, %c0_i32 : i32, i32
  }
  func.func @transform_1(%arg0: i32, %arg1: i32) -> (i32, i32) {
    %c1_i32 = arith.constant 1 : i32
    %0 = arith.muli %arg0, %c1_i32 : i32
    %1 = arith.addi %0, %arg1 : i32
    %c0_i32 = arith.constant 0 : i32
    %c0_i32_0 = arith.constant 0 : i32
    return %1, %c0_i32 : i32, i32
  }
  func.func @transform_2(%arg0: i32, %arg1: i32) -> (i32, i32, i32) {
    %c0_i32 = arith.constant 0 : i32
    %c0_i32_0 = arith.constant 0 : i32
    %c0_i32_1 = arith.constant 0 : i32
    return %arg0, %c0_i32, %c0_i32_0 : i32, i32, i32
  }
}

</mosaic_0001>

<bundles_post_ra>
// kernel: tpu_custom_call.1
= control target key start
LH: loop header
LB: loop body
LE: loop exit
PB: predicated region body
PF: predicated region fallthrough
CT: control target
= control target key end

     0   :  { %7 = vsyncpa [#allocation4], 0  ;;  %s315_s0 = inlined_call_operand.hbm [shape: f32[32,128], index: 0, kind: input, shape index: {}]   ;;  %s316_s1 = inlined_call_operand.hbm [shape: f32[32,128], index: 1, kind: input, shape index: {}]   ;;  %s317_s2 = inlined_call_operand.hbm [shape: f32[1,32,128], index: 2, kind: output, shape index: {}]  }
   0x1   :  { %8 = vsyncpa [#allocation7], 0 }
   0x2   :  { %9 = vsyncpa [#allocation5], 0  ;;  %s250_s9 = smov [#allocation3]   ;;  %s178_s13 = scalar_lea.hbm %s315_s0, 512 }
   0x3   :  { %s19_s10 = sshll.u32 %s250_s9, 4  ;;  %p179_p0 = scmp.ne.s32.totalorder %s315_s0, %s178_s13  ;;  %s20_s10 = int_to_ptr.vmem [resolvable:$true] %s19_s10 }
   0x4   :  { %p182_p1 = scmp.lt.u32.totalorder %s178_s13, %s315_s0 }
   0x6   :  { %p184_p2 = pnand %p182_p1, %p179_p0 }
   0x8   :  { %187 = shalt.err (!%p184_p2)
}
   0x9   :  { %s188_s18 = scalar_lea.vmem %s20_s10, 512  ;;  %p193_p4 = scmp.lt.s32.totalorder %s20_s10, %s20_s10 }
   0xa   :  { %p189_p3 = scmp.ne.s32.totalorder %s20_s10, %s188_s18  ;;  %p194_p5 = scmp.lt.s32.totalorder %s188_s18, %s188_s18 }
   0xc   :  { %p195_p6 = por %p194_p5, %p193_p4 }
   0xe   :  { %p196_p7 = pnand %p195_p6, %p189_p3 }
  0x10   :  { %199 = shalt.err (!%p196_p7)
}
  0x11   :  { %s251_s19 = smov 128   ;;  %s252_s20 = smov 8  }
  0x12   :  { %25 = dma.hbm_to_vmem [thread:$0]  %s315_s0, 512, %s20_s10, [#allocation4], %s251_s19, %s251_s19, %s252_s20  }
  0x13   :  { %s253_s23 = smov [#allocation6]   ;;  %s200_s27 = scalar_lea.hbm %s316_s1, 512 }
  0x14   :  { %s35_s24 = sshll.u32 %s253_s23, 4  ;;  %p201_p8 = scmp.ne.s32.totalorder %s316_s1, %s200_s27  ;;  %s36_s24 = int_to_ptr.vmem [resolvable:$true] %s35_s24 }
  0x15   :  { %p204_p9 = scmp.lt.u32.totalorder %s200_s27, %s316_s1 }
  0x17   :  { %p206_p10 = pnand %p204_p9, %p201_p8 }
  0x19   :  { %209 = shalt.err (!%p206_p10)
}
  0x1a   :  { %s210_s4 = scalar_lea.vmem %s36_s24, 512  ;;  %p215_p12 = scmp.lt.s32.totalorder %s36_s24, %s36_s24 }
  0x1b   :  { %p211_p11 = scmp.ne.s32.totalorder %s36_s24, %s210_s4  ;;  %p216_p13 = scmp.lt.s32.totalorder %s210_s4, %s210_s4 }
  0x1d   :  { %p217_p0 = por %p216_p13, %p215_p12 }
  0x1f   :  { %p218_p1 = pnand %p217_p0, %p211_p11 }
  0x21   :  { %221 = shalt.err (!%p218_p1)
}
  0x22   :  { %41 = dma.hbm_to_vmem [thread:$0]  %s316_s1, 512, %s36_s24, [#allocation7], %s251_s19, %s251_s19, %s252_s20  }
  0x23   :  { %244 = dma.done.wait [#allocation4], 512  }
  0x24   :  { %245 = vsyncadd [#allocation4], 4294966784 }
  0x25   :  { %246 = dma.done.wait [#allocation7], 512  }
  0x26   :  { %247 = vsyncadd [#allocation7], 4294966784  ;;  %v60_v0 = vld [vmem:[#allocation3] sm:$0xff]  ;;  %v61_v2 = vld [vmem:[#allocation3 + $0x8] sm:$0xff]  ;;  %s254_s1 = smov [#allocation8]  }
  0x27   :  { %v64_v1 = vld [vmem:[#allocation6] sm:$0xff]  ;;  %v76_v5 = vsub.f32 1.0, %v60_v0  ;;  %v65_v6 = vld [vmem:[#allocation6 + $0x8] sm:$0xff]  ;;  %v77_v7 = vsub.f32 1.0, %v61_v2  ;;  %v62_v8 = vld [vmem:[#allocation3 + $0x10] sm:$0xff]  ;;  %s152_s6 = sshll.u32 %s254_s1, 4  ;;  %s153_s6 = int_to_ptr.vmem [resolvable:$true] %s152_s6 }
  0x28   :  { %v68_v3 = vmul.f32 %v64_v1, %v60_v0  ;;  %v72_v4 = vsub.f32 1.0, %v64_v1  ;;  %v66_v9 = vld [vmem:[#allocation6 + $0x10] sm:$0xff]  ;;  %v69_v10 = vmul.f32 %v65_v6, %v61_v2  ;;  %v73_v11 = vsub.f32 1.0, %v65_v6  ;;  %v63_v13 = vld [vmem:[#allocation3 + $0x18] sm:$0xff]  ;;  %s222_s7 = scalar_lea.vmem %s153_s6, 512  ;;  %p227_p3 = scmp.lt.s32.totalorder %s153_s6, %s153_s6 }
  0x29   :  { %v74_v12 = vsub.f32 1.0, %v66_v9  ;;  %v67_v14 = vld [vmem:[#allocation6 + $0x18] sm:$0xff]  ;;  %v70_v16 = vmul.f32 %v66_v9, %v62_v8  ;;  %v78_v17 = vsub.f32 1.0, %v62_v8  ;;  %v79_v21 = vsub.f32 1.0, %v63_v13  ;;  %p223_p2 = scmp.ne.s32.totalorder %s153_s6, %s222_s7  ;;  %p228_p4 = scmp.lt.s32.totalorder %s222_s7, %s222_s7 }
  0x2a   :  { %v80_v15 = vmul.f32 %v76_v5, %v72_v4  ;;  %v75_v18 = vsub.f32 1.0, %v67_v14  ;;  %v81_v19 = vmul.f32 %v77_v7, %v73_v11  ;;  %v71_v20 = vmul.f32 %v67_v14, %v63_v13 }
  0x2b   :  { %v82_v23 = vmul.f32 %v78_v17, %v74_v12  ;;  %p229_p5 = por %p228_p4, %p227_p3 }
  0x2c   :  { %v84_v22 = vadd.f32 %v80_v15, %v68_v3  ;;  %v85_v24 = vadd.f32 %v81_v19, %v69_v10  ;;  %v83_v25 = vmul.f32 %v79_v21, %v75_v18 }
  0x2d   :  { %v86_v26 = vadd.f32 %v82_v23, %v70_v16  ;;  %p230_p6 = pnand %p229_p5, %p223_p2 }
  0x2e   :  { %170 = vlog2.f32 %v84_v22  ;;  %v87_v27 = vadd.f32 %v83_v25, %v71_v20  ;;  %v104_v28 = vsub.f32 1.0, %v84_v22  ;;  %v105_v29 = vsub.f32 1.0, %v85_v24 }
  0x2f   :  { %172 = vlog2.f32 %v85_v24  ;;  %v106_v30 = vsub.f32 1.0, %v86_v26 }
  0x30   :  { %174 = vlog2.f32 %v86_v26  ;;  %v107_v31 = vsub.f32 1.0, %v87_v27  ;;  %v108_v32 = vmul.f32 %v104_v28, %v104_v28  ;;  %v109_v34 = vmul.f32 %v105_v29, %v105_v29 }
  0x31   :  { %176 = vlog2.f32 %v87_v27  ;;  %v110_v37 = vmul.f32 %v106_v30, %v106_v30 }
  0x32   :  { %v111_v40 = vmul.f32 %v107_v31, %v107_v31  ;;  %v112_v43 = vadd.f32 1.0, %v108_v32  ;;  %v113_v46 = vadd.f32 1.0, %v109_v34 }
  0x33   :  { %v114_v50 = vadd.f32 1.0, %v110_v37 }
  0x34   :  { %v115_v53 = vadd.f32 1.0, %v111_v40 }
  0x38   :  { %v171_v33 = vpop.eup %170 }
  0x39   :  { %v173_v35 = vpop.eup %172  ;;  %v89_v36 = vmul.f32 0.6931472, %v171_v33 }
  0x3a   :  { %v175_v38 = vpop.eup %174  ;;  %v91_v39 = vmul.f32 0.6931472, %v173_v35 }
  0x3b   :  { %v177_v41 = vpop.eup %176  ;;  %v96_v42 = vsub.f32 0.0, %v89_v36  ;;  %v93_v44 = vmul.f32 0.6931472, %v175_v38 }
  0x3c   :  { %v97_v45 = vsub.f32 0.0, %v91_v39  ;;  %v95_v47 = vmul.f32 0.6931472, %v177_v41 }
  0x3d   :  { %v100_v48 = vmin.f32 %v96_v42, 100.0  ;;  %v98_v49 = vsub.f32 0.0, %v93_v44 }
  0x3e   :  { %v101_v51 = vmin.f32 %v97_v45, 100.0  ;;  %v99_v52 = vsub.f32 0.0, %v95_v47 }
  0x3f   :  { %v116_v54 = vmul.f32 %v112_v43, %v100_v48  ;;  %v102_v55 = vmin.f32 %v98_v49, 100.0 }
  0x40   :  { %v117_v56 = vmul.f32 %v113_v46, %v101_v51  ;;  %v103_v57 = vmin.f32 %v99_v52, 100.0 }
  0x41   :  { %143 = vst [vmem:[#allocation8] sm:$0xff] %v116_v54  ;;  %v118_v58 = vmul.f32 %v114_v50, %v102_v55 }
  0x42   :  { %144 = vst [vmem:[#allocation8 + $0x8] sm:$0xff] %v117_v56  ;;  %v119_v59 = vmul.f32 %v115_v53, %v103_v57 }
  0x43   :  { %145 = vst [vmem:[#allocation8 + $0x10] sm:$0xff] %v118_v58 }
  0x44   :  { %146 = vst [vmem:[#allocation8 + $0x18] sm:$0xff] %v119_v59 }
  0x45   :  { %233 = shalt.err (!%p230_p6)
}
  0x46   :  { %s234_s10 = scalar_lea.hbm %s317_s2, 512 }
  0x47   :  { %p235_p7 = scmp.ne.s32.totalorder %s317_s2, %s234_s10  ;;  %p238_p8 = scmp.lt.u32.totalorder %s234_s10, %s317_s2 }
  0x49   :  { %p240_p9 = pnand %p238_p8, %p235_p7 }
  0x4b   :  { %243 = shalt.err (!%p240_p9)
}
  0x4c   :  { %158 = dma.vmem_to_hbm [thread:$0]  %s153_s6, 512, %s317_s2, [#allocation5], %s251_s19, %s251_s19, %s252_s20  }
  0x4d   :  { %248 = dma.done.wait [#allocation5], 512  }
  0x4e   :  { %249 = vsyncadd [#allocation5], 4294966784 }
  0x4f   :  { %162 = vsyncpa [#allocation4], 1 }
  0x50   :  { %163 = vsyncpa [#allocation7], 1 }
  0x51   :  { %164 = vsyncpa [#allocation5], 1 }

</bundles_post_ra>
